<compile_context>
chip_gen: v7x
topology: tpu7x:2x2x1
jax: 0.10.0
libtpu: 0.0.40
codegen_flags: <defaults>
</compile_context>

<pallas_src>
import functools

import jax
import jax.numpy as jnp
from jax import lax
from jax.experimental import pallas as pl
from jax.experimental.pallas import tpu as pltpu


def _cross_entropy_tile_kernel(logits_ref, target_ref, out_ref, *, n):
    # logits_ref: (TILE_N, C)   native dtype, VMEM
    # target_ref: (TILE_N, 1)   int32, VMEM
    # out_ref:    (1, 8, 128)   f32; per-tile loss sum broadcast across block
    tile_n, c = logits_ref.shape
    tgt = target_ref[...]                                          # (TILE_N, 1)

    # Row validity: in-bounds (partial last tile) and not ignore_index=-100.
    row_ids = lax.broadcasted_iota(jnp.int32, (tile_n, 1), 0)
    global_row = pl.program_id(0) * tile_n + row_ids
    valid = (global_row < n) & (tgt != -100)

    logits = logits_ref[...]                                       # native dtype
    # Numerically stable log-sum-exp.  The row max is exact in the native
    # dtype; only the result is cast.  The f32 cast of the full tile is folded
    # into the exp chain (streamed, not held as a named full-tile temporary).
    m = jnp.max(logits, axis=-1, keepdims=True).astype(jnp.float32)
    sum_exp = jnp.sum(jnp.exp(logits.astype(jnp.float32) - m),
                      axis=-1, keepdims=True)

    # Gather logits[i, tgt[i]] with a select against a class-id iota
    # (exactly one hit per valid row, so the row sum is the picked logit).
    class_ids = lax.broadcasted_iota(jnp.int32, (tile_n, c), 1)
    picked = jnp.sum(
        jnp.where(class_ids == tgt, logits, 0).astype(jnp.float32),
        axis=-1, keepdims=True)

    # loss_i = logsumexp(x_i) - x_i[t_i] = m_i + log(sum exp(x_i - m_i)) - x_i[t_i]
    per_example = m + jnp.log(sum_exp) - picked                    # (TILE_N, 1)
    per_example = jnp.where(valid, per_example, 0.0)               # mask pad/ignored

    tile_sum = jnp.sum(per_example)                                # scalar f32
    out_ref[...] = jnp.broadcast_to(tile_sum, (1, 8, 128)).astype(jnp.float32)


def _round_up(x: int, m: int) -> int:
    return ((x + m - 1) // m) * m


def _sublane_multiple(dtype) -> int:
    # Native sublane packing: f32 -> 8, bf16/f16 -> 16, int8/fp8 -> 32.
    return {4: 8, 2: 16, 1: 32}.get(jnp.dtype(dtype).itemsize, 8)


def _vmem_capacity_bytes() -> int:
    try:
        return int(pltpu.get_tpu_info().vmem_capacity_bytes)
    except Exception:
        return 64 * 1024 * 1024  # conservative: v7x per-TensorCore VMEM


def _pick_tile_n(n: int, c: int, dtype) -> int:
    itemsize = jnp.dtype(dtype).itemsize
    sub = _sublane_multiple(dtype)
    # Budget covers the double-buffered logits tiles plus ~f32-tile-sized
    # intermediates; <= 1/4 of the queried per-core VMEM, capped at 24 MiB
    # (safe on v5e/v6e/v7x without relying on scoped defaults).
    budget = min(_vmem_capacity_bytes() // 4, 24 * 1024 * 1024)
    per_row_bytes = 2 * c * itemsize + 2 * c * 4
    max_rows = max(sub, budget // max(1, per_row_bytes))
    n_pad = _round_up(n, sub)
    tile = min(n_pad, max_rows)
    # Keep >= 2 grid steps when possible so v7x's two TensorCores both get work.
    if n_pad > sub:
        tile = min(tile, _round_up(pl.cdiv(n_pad, 2), sub))
    return max(sub, (tile // sub) * sub)


@functools.partial(jax.jit, static_argnames=("tile_n",))
def classification_loss(logits: jax.Array, target: jax.Array,
                        tile_n: int | None = None) -> jax.Array:
    """Cross-entropy with mean reduction, matching F.cross_entropy(weight=None)."""
    n, c = logits.shape
    sub = _sublane_multiple(logits.dtype)

    if tile_n is None:
        tile_n = _pick_tile_n(n, c, logits.dtype)
    tile_n = max(sub, (min(int(tile_n), _round_up(n, sub)) // sub) * sub)

    num_tiles = pl.cdiv(n, tile_n)
    target_2d = target.astype(jnp.int32).reshape(n, 1)
    vmem_limit = int(min(_vmem_capacity_bytes() // 2, 64 * 1024 * 1024))

    kernel = functools.partial(_cross_entropy_tile_kernel, n=n)

    tile_sums = pl.pallas_call(
        kernel,
        out_shape=jax.ShapeDtypeStruct((num_tiles, 8, 128), jnp.float32),
        grid_spec=pl.GridSpec(
            grid=(num_tiles,),
            in_specs=[
                pl.BlockSpec((tile_n, c), lambda i: (i, 0)),
                pl.BlockSpec((tile_n, 1), lambda i: (i, 0)),
            ],
            out_specs=pl.BlockSpec((1, 8, 128), lambda i: (i, 0, 0)),
        ),
        compiler_params=pltpu.CompilerParams(
            dimension_semantics=("parallel",),
            vmem_limit_bytes=vmem_limit,
        ),
    )(logits, target_2d)

    # Mean over non-ignored rows (PyTorch ignore_index=-100).  If every row is
    # ignored this is 0/0 = NaN, matching torch's behavior.
    denom = jnp.sum((target != -100).astype(jnp.float32))
    return jnp.sum(tile_sums[:, 0, 0]) / denom
    # TODO(synk): class-weighted loss (weight != None) and a C-tiled online
    # log-sum-exp path for vocab-scale class counts are not implemented; the
    # module's default construction uses weight=None and modest C.


def _reference_loss(logits, target):
    logp = jax.nn.log_softmax(logits.astype(jnp.float32), axis=-1)
    nll = -jnp.take_along_axis(logp, target.reshape(-1, 1), axis=-1)
    return jnp.mean(nll)


if __name__ == "__main__":
    key = jax.random.PRNGKey(0)
    k_logits, k_target = jax.random.split(key)

    # Small shapes; batch deliberately NOT a multiple of the tile so the
    # partial-last-tile masking path is exercised.
    batch, num_classes = 50, 32
    logits = jax.random.normal(k_logits, (batch, num_classes), dtype=jnp.float32)
    target = jax.random.randint(k_target, (batch,), 0, num_classes, dtype=jnp.int32)

    ref = jax.block_until_ready(_reference_loss(logits, target))

    # Explicit small tile (forces 4 grid steps + partial tile).
    loss = jax.block_until_ready(classification_loss(logits, target, tile_n=16))
    assert jnp.allclose(loss, ref, atol=1e-5, rtol=1e-5), (loss, ref)

    # Auto tile-size path.
    loss2 = jax.block_until_ready(classification_loss(logits, target))
    assert jnp.allclose(loss2, ref, atol=1e-5, rtol=1e-5), (loss2, ref)

    print("KERNEL_OK")
</pallas_src>

<mosaic_0001>
module attributes {stable_mosaic.version = 11 : i64} {
  func.func @_cross_entropy_tile_kernel(%arg0: i32, %arg1: memref<16x32xf32, #tpu.memory_space<vmem>>, %arg2: memref<16x1xi32, #tpu.memory_space<vmem>>, %arg3: memref<1x8x128xf32, #tpu.memory_space<vmem>>) attributes {dimension_semantics = [#tpu.dimension_semantics<parallel>], iteration_bounds = array<i64: 4>, scalar_prefetch = 0 : i64, scratch_operands = 0 : i64, tpu.core_type = #tpu.core_type<tc>, window_params = [{transform_indices = @transform_0, window_bounds = array<i64: 16, 32>}, {transform_indices = @transform_1, window_bounds = array<i64: 16, 1>}, {transform_indices = @transform_2, window_bounds = array<i64: 1, 8, 128>}]} {
    %c0 = arith.constant 0 : index
    %c0_0 = arith.constant 0 : index
    %0 = vector.load %arg2[%c0, %c0_0] : memref<16x1xi32, #tpu.memory_space<vmem>>, vector<16x1xi32>
    %1 = tpu.iota {dimensions = array<i32: 0>} : vector<16x1xi32>
    %c16_i32 = arith.constant 16 : i32
    %2 = arith.muli %arg0, %c16_i32 : i32
    %3 = vector.broadcast %2 : i32 to vector<16x1xi32>
    %4 = arith.addi %3, %1 : vector<16x1xi32>
    %c50_i32 = arith.constant 50 : i32
    %5 = vector.broadcast %c50_i32 : i32 to vector<16x1xi32>
    %6 = arith.cmpi slt, %4, %5 : vector<16x1xi32>
    %c-100_i32 = arith.constant -100 : i32
    %7 = vector.broadcast %c-100_i32 : i32 to vector<16x1xi32>
    %8 = arith.cmpi ne, %0, %7 : vector<16x1xi32>
    %9 = arith.andi %6, %8 : vector<16x1xi1>
    %c0_1 = arith.constant 0 : index
    %c0_2 = arith.constant 0 : index
    %10 = vector.load %arg1[%c0_1, %c0_2] : memref<16x32xf32, #tpu.memory_space<vmem>>, vector<16x32xf32>
    %cst = arith.constant dense<0xFF800000> : vector<16xf32>
    %11 = vector.multi_reduction <maximumf>, %10, %cst [1] : vector<16x32xf32> to vector<16xf32>
    %12 = vector.shape_cast %11 : vector<16xf32> to vector<16x1xf32>
    %13 = vector.broadcast %12 : vector<16x1xf32> to vector<16x32xf32>
    %14 = arith.subf %10, %13 : vector<16x32xf32>
    %15 = math.exp %14 : vector<16x32xf32>
    %cst_3 = arith.constant dense<0.000000e+00> : vector<16xf32>
    %16 = vector.multi_reduction <add>, %15, %cst_3 [1] : vector<16x32xf32> to vector<16xf32>
    %17 = vector.shape_cast %16 : vector<16xf32> to vector<16x1xf32>
    %18 = tpu.iota {dimensions = array<i32: 1>} : vector<16x32xi32>
    %19 = vector.broadcast %0 : vector<16x1xi32> to vector<16x32xi32>
    %20 = arith.cmpi eq, %18, %19 : vector<16x32xi32>
    %c0_i32 = arith.constant 0 : i32
    %21 = arith.sitofp %c0_i32 : i32 to f32
    %22 = vector.broadcast %21 : f32 to vector<16x32xf32>
    %23 = arith.select %20, %10, %22 : vector<16x32xi1>, vector<16x32xf32>
    %cst_4 = arith.constant dense<0.000000e+00> : vector<16xf32>
    %24 = vector.multi_reduction <add>, %23, %cst_4 [1] : vector<16x32xf32> to vector<16xf32>
    %25 = vector.shape_cast %24 : vector<16xf32> to vector<16x1xf32>
    %26 = math.log %17 : vector<16x1xf32>
    %27 = arith.addf %12, %26 : vector<16x1xf32>
    %28 = arith.subf %27, %25 : vector<16x1xf32>
    %cst_5 = arith.constant 0.000000e+00 : f32
    %29 = vector.broadcast %cst_5 : f32 to vector<16x1xf32>
    %30 = arith.select %9, %28, %29 : vector<16x1xi1>, vector<16x1xf32>
    %31 = vector.shape_cast %30 : vector<16x1xf32> to vector<1x16x1xf32>
    %cst_6 = arith.constant dense<0.000000e+00> : vector<1xf32>
    %32 = vector.multi_reduction <add>, %31, %cst_6 [1, 2] : vector<1x16x1xf32> to vector<1xf32>
    %33 = vector.shape_cast %32 : vector<1xf32> to vector<1x1x1xf32>
    %34 = vector.extract %33[0, 0, 0] : f32 from vector<1x1x1xf32>
    %35 = vector.broadcast %34 : f32 to vector<1x8x128xf32>
    %c0_7 = arith.constant 0 : index
    %c0_8 = arith.constant 0 : index
    %c0_9 = arith.constant 0 : index
    %36 = vector.load %arg3[%c0_7, %c0_8, %c0_9] : memref<1x8x128xf32, #tpu.memory_space<vmem>>, vector<1x8x128xf32>
    tpu.vector_store %arg3[%c0_7, %c0_8, %c0_9], %35 {strides = array<i32>} : memref<1x8x128xf32, #tpu.memory_space<vmem>>, vector<1x8x128xf32>,
    return
  }
  func.func @transform_0(%arg0: i32) -> (i32, i32) {
    %c0_i32 = arith.constant 0 : i32
    %c0_i32_0 = arith.constant 0 : i32
    return %arg0, %c0_i32 : i32, i32
  }
  func.func @transform_1(%arg0: i32) -> (i32, i32) {
    %c0_i32 = arith.constant 0 : i32
    %c0_i32_0 = arith.constant 0 : i32
    return %arg0, %c0_i32 : i32, i32
  }
  func.func @transform_2(%arg0: i32) -> (i32, i32, i32) {
    %c0_i32 = arith.constant 0 : i32
    %c0_i32_0 = arith.constant 0 : i32
    %c0_i32_1 = arith.constant 0 : i32
    return %arg0, %c0_i32, %c0_i32_0 : i32, i32, i32
  }
}

</mosaic_0001>

<bundles_post_ra>
// kernel: classification_loss.1
= control target key start
LH: loop header
LB: loop body
LE: loop exit
PB: predicated region body
PF: predicated region fallthrough
CT: control target
= control target key end

     0   :  { %s408_s9 = smov 0   ;;  %s452_s0 = inlined_call_operand.vmem [shape: f32[50,32], index: 0, kind: input, shape index: {}]   ;;  %s453_s1 = inlined_call_operand.vmem [shape: s32[50,1], index: 1, kind: input, shape index: {}]   ;;  %s454_s2 = inlined_call_operand.vmem [shape: f32[4,8,128], index: 2, kind: output, shape index: {}]  }
   0x1 LB: > { %s414_s10 = sadd.s32 4294967295, %s390_s9   ;;  %p354_p0 = scmp.ge.s32.totalorder %s390_s9, 1  ;;  %s390_s9 = sphi %s408_s9, %s12_s9  }
   0x2   : > { %p140_p1 = scmp.lt.s32.totalorder %s390_s9, 5 }
   0x4   : > { %p141_p2 = pnand %p354_p0, %p140_p1 }
   0x5   : > { %s355_s11 = sshll.u32 (!%p141_p2), %s414_s10, 1  ;;  %v208_v0 = vlaneseq (!%p141_p2)  ;;  %s360_s12 = sshll.u32 (!%p141_p2), %s414_s10, 4  ;;  %v392_v1 = vmov (!%p141_p2), 0   ;;  %vm223_vm0 = vcmask (!%p141_p2), 261120   ;;  %vm270_vm9 = vcmask (!%p141_p2), 7168  }
   0x6   : > { %144 = sbr.rel (%p141_p2) target bundleno = 549 (0x225), region = 28  ;;  %p179_p3 = scmp.lt.s32.totalorder (!%p141_p2), %s355_s11, 6  ;;  %374 = vset.pattern.permute.xlu1 (!%p141_p2), %v392_v1  ;;  %v212_v2 = vstv (!%p141_p2), %s360_s12  ;;  %375 = vset.pattern.permute.xlu0 (!%p141_p2), %v392_v1 }
   0x7   : > { %v209_v3 = vshrl.u32 (!%p141_p2), %v208_v0, 7  ;;  %v243_v19 = vand.u32 (!%p141_p2), 127, %v208_v0  ;;  %p202_p4 = scmp.lt.s32.totalorder (!%p141_p2), %s414_s10, 3 }
   0x9   : > { %v213_v4 = vadd.s32 (!%p141_p2), %v212_v2, %v209_v3  ;;  %v210_v29 = vadd.s32 (!%p141_p2), 8, %v209_v3 }
   0xb   : > { %vm215_vm1 = vcmp.lt.s32.totalorder (!%p141_p2), %v213_v4, 50  ;;  %v214_v30 = vadd.s32 (!%p141_p2), %v212_v2, %v210_v29 }
   0xd   : > { %s460_s11 = smov (!%p179_p3, %s355_s11), 6  ;;  %vm216_vm7 = vcmp.lt.s32.totalorder %v214_v30, 50  ;;  %s462_s10 = smov (!%p202_p4, %s414_s10), 3 }
   0xe   : > { %s356_s13 = sshll.u32 %s460_s11, 3  ;;  %s359_s20 = sshll.u32 %s462_s10, 3 }
   0xf   : > { %s182_s16 = scalar_lea.vmem %s452_s0, %s356_s13  ;;  %s196_s19 = scalar_lea.vmem %s453_s1, %s356_s13 }
  0x10   : > { %v221_v5 = vld [vmem:[%s182_s16] sm:$0xff]  ;;  %v222_v6 = vld [vmem:[%s182_s16 + $0x8] sm:$0xff]  ;;  %s205_s23 = scalar_lea.vmem %s454_s2, %s359_s20 }
  0x11   : > { %v206_v7 = vld [vmem:[%s196_s19] sm:$0xff]  ;;  %v224_v8 = vsel %vm223_vm0, %v221_v5, -inf  ;;  %v207_v10 = vld [vmem:[%s196_s19 + $0x8] sm:$0xff]  ;;  %v227_v11 = vsel %vm223_vm0, %v222_v6, -inf }
  0x12   : > { %245 = vperm.xlu1 %374, %v206_v7   ;;  %vm217_vm2 = vcmp.ne.s32.totalorder %v206_v7, 4294967196  ;;  %225 = vmax.xlane.f32.xlu0 %v224_v8  ;;  %vm218_vm6 = vcmp.ne.s32.totalorder %v207_v10, 4294967196 }
  0x13   : > { %vm427_vm3 = vmand %vm215_vm1, %vm217_vm2 }
  0x14   : > { %vm436_vm8 = vmand %vm216_vm7, %vm218_vm6 }
  0x16   : > { %248 = vperm.xlu1 %374, %v207_v10   ;;  %228 = vmax.xlane.f32.xlu0 %v227_v11 }
  0x91   : > { %v246_v18 = vpop.permute.xlu1 %245 }
  0x92   : > { %vm250_vm4 = vcmp.eq.s32.totalorder %v243_v19, %v246_v18 }
  0x93   : > { %v252_v22 = vsel %vm250_vm4, %v221_v5, 0.0 }
  0x94   : > { %v254_v24 = vsel %vm223_vm0, %v252_v22, 0.0 }
  0x95   : > { %v249_v20 = vpop.permute.xlu1 %248 }
  0x96   : > { %vm251_vm5 = vcmp.eq.s32.totalorder %v243_v19, %v249_v20 }
  0x97   : > { %v253_v26 = vsel %vm251_vm5, %v222_v6, 0.0 }
  0x98   : > { %v257_v28 = vsel %vm223_vm0, %v253_v26, 0.0 }
  0x9f   : > { %v226_v12 = vpop.xlane.xlu0 %225 }
  0xa0   : > { %v230_v13 = vsub.f32 %v221_v5, %v226_v12 }
  0xa2   : > { %v232_v14 = vmul.f32 1.442695, %v230_v13 }
  0xa3   : > { %v229_v15 = vpop.xlane.xlu0 %228 }
  0xa4   : > { %376 = vpow2.f32 %v232_v14  ;;  %v231_v16 = vsub.f32 %v222_v6, %v229_v15 }
  0xa6   : > { %v234_v17 = vmul.f32 1.442695, %v231_v16 }
  0xa8   : > { %378 = vpow2.f32 %v234_v17 }
  0xae   : > { %v377_v21 = vpop.eup %376 }
  0xaf   : > { %v236_v23 = vsel %vm223_vm0, %v377_v21, 0.0 }
  0xb0   : > { %237 = vadd.xlane.f32.xlu0 %v236_v23 }
  0xb2   : > { %v379_v25 = vpop.eup %378 }
  0xb3   : > { %v239_v27 = vsel %vm223_vm0, %v379_v25, 0.0 }
  0xb4   : > { %240 = vadd.xlane.f32.xlu1 %v239_v27  ;;  %255 = vadd.xlane.f32.xlu0 %v254_v24 }
  0xb8   : > { %258 = vadd.xlane.f32.xlu0 %v257_v28 }
 0x13d   : > { %v238_v32 = vpop.xlane.xlu0 %237 }
 0x13e   : > { %380 = vlog2.f32 %v238_v32 }
 0x141   : > { %v241_v33 = vpop.xlane.xlu1 %240  ;;  %v256_v36 = vpop.xlane.xlu0 %255 }
 0x142   : > { %382 = vlog2.f32 %v241_v33 }
 0x145   : > { %v259_v42 = vpop.xlane.xlu0 %258 }
 0x148   : > { %v381_v34 = vpop.eup %380 }
 0x149   : > { %v261_v35 = vmul.f32 0.6931472, %v381_v34 }
 0x14b   : > { %v264_v37 = vadd.f32 %v261_v35, %v226_v12 }
 0x14c   : > { %v383_v38 = vpop.eup %382 }
 0x14d   : > { %v263_v39 = vmul.f32 0.6931472, %v383_v38  ;;  %v266_v40 = vsub.f32 %v264_v37, %v256_v36 }
 0x14f   : > { %v265_v41 = vadd.f32 %v263_v39, %v229_v15  ;;  %v268_v43 = vsel %vm427_vm3, %v266_v40, 0.0 }
 0x150   : > { %v271_v46 = vsel %vm270_vm9, %v268_v43, 0.0 }
 0x151   : > { %v267_v44 = vsub.f32 %v265_v41, %v259_v42 }
 0x153   : > { %v269_v45 = vsel %vm436_vm8, %v267_v44, 0.0 }
 0x154   : > { %v272_v47 = vsel %vm270_vm9, %v269_v45, 0.0 }
 0x155   : > { %v273_v48 = vadd.f32 %v272_v47, %v271_v46 }
 0x157   : > { %274 = vadd.xlane.f32.xlu0 %v273_v48 }
 0x1e4   : > { %v275_v49 = vpop.xlane.xlu0 %274 }
 0x1e5   : > { %v276_v50 = vrot.slane %v275_v49, 4 }
 0x1e7   : > { %v277_v51 = vadd.f32 %v276_v50, %v275_v49 }
 0x1e9   : > { %v278_v52 = vrot.slane %v277_v51, 2 }
 0x1eb   : > { %v279_v53 = vadd.f32 %v278_v52, %v277_v51 }
 0x1ed   : > { %v280_v54 = vrot.slane %v279_v53, 1 }
 0x1ef   : > { %v281_v55 = vadd.f32 %v280_v54, %v279_v53 }
 0x1f1   : > { %363 = vpush %v281_v55 }
 0x222   : > { %s364_s24 = spop %363 }
 0x223   : > { %v283_v56 = vstv %s364_s24 }
 0x224   : > { %284 = vst [vmem:[%s205_s23] sm:$0xff] %v283_v56 }
 0x225 PF: > { %s12_s9 = sadd.s32 1, %s390_s9  }
 0x226   : > { %p9_p5 = scmp.ge.s32.totalorder %s12_s9, 6  }
 0x228   :  { %11 = sbr.rel (!%p9_p5) target bundleno = 1 (0x1), region = 61 }

</bundles_post_ra>
